<compile_context>
chip_gen: v7x
topology: tpu7x:2x2x1
jax: 0.10.0
libtpu: 0.0.40
codegen_flags: <defaults>
</compile_context>

<pallas_src>
import functools

import jax
import jax.numpy as jnp
from jax import lax
from jax.experimental import pallas as pl
from jax.experimental.pallas import tpu as pltpu

GAMMA = 1.5
ALPHA = 0.25
LANE = 128
SUBLANE = 8
BLOCK_ROWS_TARGET = 4096     # (4096,128) f32 = 2 MiB per input per block
CHUNK_ROWS = 512             # in-kernel streaming chunk (bounds VMEM temporaries)


def _num_tensorcores():
    """Best-effort TensorCore count (2 on v7x-style megacore parts, else 1)."""
    try:
        info = pltpu.get_tpu_info()
        for attr in ("num_cores", "num_tensorcores", "tensorcore_count",
                     "num_cores_per_chip", "cores_per_chip"):
            v = getattr(info, attr, None)
            if isinstance(v, int) and not isinstance(v, bool) and 1 <= v <= 8:
                return v
    except Exception:
        pass
    try:
        if "v7" in jax.devices()[0].device_kind.lower():
            return 2
    except Exception:
        pass
    return 1


def _pick_chunk(block_rows):
    """Largest chunk size that evenly divides the block (None -> single pass)."""
    if block_rows <= CHUNK_ROWS:
        return None
    for c in (CHUNK_ROWS, 256, 128, 64, 32, 16, 8):
        if block_rows % c == 0:
            return c
    return None


def _qfocal_kernel(pred_ref, true_ref, out_ref, *,
                   gamma, af_scale, af_bias,
                   block_rows, chunk_rows, steps_per_core,
                   n_valid, need_mask):
    c = pl.program_id(0)                       # core ("parallel") axis
    i = pl.program_id(1)                       # step ("arbitrary") reduction axis
    # Logical (unclamped) first row of this block in the (rows, 128) view.
    block_row0 = (c * steps_per_core + i) * block_rows

    full_rows = n_valid // LANE                # fully-valid rows
    rem_lanes = n_valid % LANE                 # valid lanes in row `full_rows`

    def tile_loss(x, t, row0):
        x = x.astype(jnp.float32)
        t = t.astype(jnp.float32)
        # One shared exponential feeds both the stable BCE and the sigmoid.
        z = jnp.exp(-jnp.abs(x))                           # exp(-|x|) in (0, 1]
        bce = jnp.maximum(x, 0.0) - x * t + jnp.log1p(z)   # BCEWithLogitsLoss('none')
        # sigmoid(x) = [x>=0 ? 1 : z] / (1 + z); reciprocal runs on the EUP slot.
        p = jnp.where(x >= 0.0, 1.0, z) * pl.reciprocal(1.0 + z, approx=True)
        af = t * af_scale + af_bias                        # t*a + (1-t)*(1-a)
        d = jnp.abs(t - p)
        if gamma == 1.5:
            mf = d * jnp.sqrt(d)        # |t-p|**1.5 without exp/log, exact at d == 0
        elif gamma == 2.0:
            mf = d * d
        elif gamma == 1.0:
            mf = d
        else:
            mf = d ** gamma
        loss = bce * af * mf
        if need_mask:
            # Zero every element whose global index >= n_valid (ragged tail,
            # partial last block, or clamped overhang blocks reading garbage).
            grow = row0 + lax.broadcasted_iota(jnp.int32, loss.shape, 0)
            if rem_lanes == 0:
                mask = grow < full_rows
            else:
                lane = lax.broadcasted_iota(jnp.int32, loss.shape, 1)
                mask = (grow < full_rows) | ((grow == full_rows) & (lane < rem_lanes))
            loss = jnp.where(mask, loss, 0.0)
        return loss

    if chunk_rows is not None:
        n_chunks = block_rows // chunk_rows

        def chunk_body(k, acc):
            r0 = pl.multiple_of(k * chunk_rows, chunk_rows)
            loss = tile_loss(pred_ref[pl.ds(r0, chunk_rows), :],
                             true_ref[pl.ds(r0, chunk_rows), :],
                             block_row0 + r0)
            # (chunk,128) -> (chunk/8, 8, 128) is layout-aligned; VPU adds only.
            return acc + loss.reshape(-1, SUBLANE, LANE).sum(axis=0)

        partial = lax.fori_loop(0, n_chunks, chunk_body,
                                jnp.zeros((SUBLANE, LANE), jnp.float32))
    else:
        loss = tile_loss(pred_ref[...], true_ref[...], block_row0)
        if block_rows % SUBLANE == 0:
            partial = loss.reshape(-1, SUBLANE, LANE).sum(axis=0)
        else:
            # Tiny-input fallback (rows not a multiple of 8): cross-sublane sum.
            row_sum = loss.sum(axis=0, keepdims=True)                 # (1, 128)
            row0_mask = lax.broadcasted_iota(jnp.int32, (SUBLANE, LANE), 0) == 0
            partial = jnp.where(row0_mask,
                                jnp.broadcast_to(row_sum, (SUBLANE, LANE)), 0.0)

    @pl.when(i == 0)
    def _():
        out_ref[...] = jnp.zeros_like(out_ref)

    out_ref[...] += partial[None]


def qfocal_loss(pred, true, gamma=GAMMA, alpha=ALPHA, reduction="mean"):
    """pred, true: same-shape arrays (e.g. NCHW). Returns scalar mean/sum loss."""
    assert pred.shape == true.shape
    if reduction not in ("mean", "sum"):
        # TODO(synk): reduction='none' (elementwise output) not kernelized.
        raise NotImplementedError("reduction must be 'mean' or 'sum'")

    n_total = pred.size

    # Keep the `true` HBM stream as narrow as the caller provides; the kernel
    # upcasts to f32.  Bools are widened to int8 for layout safety only.
    if true.dtype == jnp.bool_:
        true = true.astype(jnp.int8)

    pred_flat = pred.reshape(-1)             # bitcast: no HBM copy
    true_flat = true.reshape(-1)

    rem = n_total % LANE
    if rem:
        # TODO(synk): the <128-element tail could be a pure-JAX epilogue to avoid
        # this copy; values are masked in-kernel so the pad contents don't matter.
        pad = LANE - rem
        pred_flat = jnp.pad(pred_flat, (0, pad))
        true_flat = jnp.pad(true_flat, (0, pad))
    rows = pred_flat.size // LANE

    pred2d = pred_flat.reshape(rows, LANE)   # bitcast: no HBM copy
    true2d = true_flat.reshape(rows, LANE)

    block_rows = BLOCK_ROWS_TARGET if rows > BLOCK_ROWS_TARGET else rows
    total_blocks = pl.cdiv(rows, block_rows)
    ncores = _num_tensorcores() if total_blocks >= 2 else 1
    ncores = max(1, min(ncores, total_blocks))
    steps_per_core = pl.cdiv(total_blocks, ncores)
    chunk_rows = _pick_chunk(block_rows)
    capacity = ncores * steps_per_core * block_rows * LANE
    need_mask = capacity != n_total
    last_block = total_blocks - 1
    needs_clamp = ncores * steps_per_core != total_blocks

    def in_index(c, i):
        b = c * steps_per_core + i
        if needs_clamp:
            b = jnp.minimum(b, last_block)   # overhang blocks re-read the tail; masked
        return (b, 0)

    kernel = functools.partial(
        _qfocal_kernel,
        gamma=float(gamma),
        af_scale=float(2.0 * alpha - 1.0),   # t*a + (1-t)*(1-a) == t*(2a-1) + (1-a)
        af_bias=float(1.0 - alpha),
        block_rows=block_rows,
        chunk_rows=chunk_rows,
        steps_per_core=steps_per_core,
        n_valid=n_total,
        need_mask=need_mask,
    )

    partials = pl.pallas_call(
        kernel,
        out_shape=jax.ShapeDtypeStruct((ncores, SUBLANE, LANE), jnp.float32),
        grid_spec=pltpu.PrefetchScalarGridSpec(
            num_scalar_prefetch=0,
            grid=(ncores, steps_per_core),
            in_specs=[
                pl.BlockSpec((block_rows, LANE), in_index),
                pl.BlockSpec((block_rows, LANE), in_index),
            ],
            out_specs=pl.BlockSpec((1, SUBLANE, LANE), lambda c, i: (c, 0, 0)),
        ),
        compiler_params=pltpu.CompilerParams(
            dimension_semantics=("parallel", "arbitrary"),
            vmem_limit_bytes=32 * 1024 * 1024,
        ),
    )(pred2d, true2d)

    total = jnp.sum(partials)        # tiny cross-lane/core reduce in XLA
    if reduction == "sum":
        return total
    return total / jnp.float32(n_total)


def qfocal_loss_ref(pred, true, gamma=GAMMA, alpha=ALPHA):
    """Pure-JAX reference matching the PyTorch forward (reduction='mean')."""
    x = pred.astype(jnp.float32)
    t = true.astype(jnp.float32)
    bce = jnp.maximum(x, 0.0) - x * t + jnp.log1p(jnp.exp(-jnp.abs(x)))
    p = jax.nn.sigmoid(x)
    af = t * alpha + (1.0 - t) * (1.0 - alpha)
    mf = jnp.abs(t - p) ** gamma
    return jnp.mean(bce * af * mf)


if __name__ == "__main__":
    key = jax.random.PRNGKey(0)
    k1, k2, k3, k4 = jax.random.split(key, 4)

    # Primary small case: NCHW logits, batch=2, channels=4, spatial=16x16.
    pred = jax.random.normal(k1, (2, 4, 16, 16), dtype=jnp.float32)
    true = (jax.random.uniform(k2, (2, 4, 16, 16)) > 0.5).astype(jnp.float32)
    out = jax.block_until_ready(qfocal_loss(pred, true))
    ref = qfocal_loss_ref(pred, true)
    assert jnp.allclose(out, ref, rtol=2e-3, atol=1e-5), (out, ref)

    # Larger case exercising the multi-step grid, the in-kernel chunk loop and
    # the partial-last-block masking (no wrapper padding copy required).
    pred2 = jax.random.normal(k3, (4, 16, 96, 96), dtype=jnp.float32)
    true2 = (jax.random.uniform(k4, (4, 16, 96, 96)) > 0.5).astype(jnp.float32)
    out2 = jax.block_until_ready(qfocal_loss(pred2, true2))
    ref2 = qfocal_loss_ref(pred2, true2)
    assert jnp.allclose(out2, ref2, rtol=2e-3, atol=1e-5), (out2, ref2)

    print("KERNEL_OK")
</pallas_src>

<mosaic_0001>
module attributes {stable_mosaic.version = 11 : i64} {
  func.func @_qfocal_kernel(%arg0: i32, %arg1: i32, %arg2: memref<16x128xf32, #tpu.memory_space<vmem>>, %arg3: memref<16x128xf32, #tpu.memory_space<vmem>>, %arg4: memref<1x8x128xf32, #tpu.memory_space<vmem>>) attributes {dimension_semantics = [#tpu.dimension_semantics<parallel>, #tpu.dimension_semantics<arbitrary>], iteration_bounds = array<i64: 1, 1>, scalar_prefetch = 0 : i64, scratch_operands = 0 : i64, tpu.core_type = #tpu.core_type<tc>, window_params = [{transform_indices = @transform_0, window_bounds = array<i64: 16, 128>}, {transform_indices = @transform_1, window_bounds = array<i64: 16, 128>}, {transform_indices = @transform_2, window_bounds = array<i64: 1, 8, 128>}]} {
    %c0 = arith.constant 0 : index
    %c0_0 = arith.constant 0 : index
    %0 = vector.load %arg2[%c0, %c0_0] : memref<16x128xf32, #tpu.memory_space<vmem>>, vector<16x128xf32>
    %c0_1 = arith.constant 0 : index
    %c0_2 = arith.constant 0 : index
    %1 = vector.load %arg3[%c0_1, %c0_2] : memref<16x128xf32, #tpu.memory_space<vmem>>, vector<16x128xf32>
    %2 = math.absf %0 : vector<16x128xf32>
    %cst = arith.constant 0.000000e+00 : f32
    %3 = vector.broadcast %cst : f32 to vector<16x128xf32>
    %4 = arith.subf %3, %2 : vector<16x128xf32>
    %5 = math.exp %4 : vector<16x128xf32>
    %cst_3 = arith.constant 0.000000e+00 : f32
    %6 = vector.broadcast %cst_3 : f32 to vector<16x128xf32>
    %7 = arith.maximumf %0, %6 : vector<16x128xf32>
    %8 = arith.mulf %0, %1 : vector<16x128xf32>
    %9 = arith.subf %7, %8 : vector<16x128xf32>
    %10 = math.log1p %5 : vector<16x128xf32>
    %11 = arith.addf %9, %10 : vector<16x128xf32>
    %cst_4 = arith.constant 0.000000e+00 : f32
    %12 = vector.broadcast %cst_4 : f32 to vector<16x128xf32>
    %13 = arith.cmpf oge, %0, %12 : vector<16x128xf32>
    %cst_5 = arith.constant 1.000000e+00 : f32
    %14 = vector.broadcast %cst_5 : f32 to vector<16x128xf32>
    %15 = arith.select %13, %14, %5 : vector<16x128xi1>, vector<16x128xf32>
    %cst_6 = arith.constant 1.000000e+00 : f32
    %16 = vector.broadcast %cst_6 : f32 to vector<16x128xf32>
    %17 = arith.addf %16, %5 : vector<16x128xf32>
    %18 = tpu.reciprocal %17 {approx = true} : vector<16x128xf32> -> vector<16x128xf32>
    %19 = arith.mulf %15, %18 : vector<16x128xf32>
    %cst_7 = arith.constant -5.000000e-01 : f32
    %20 = vector.broadcast %cst_7 : f32 to vector<16x128xf32>
    %21 = arith.mulf %1, %20 : vector<16x128xf32>
    %cst_8 = arith.constant 7.500000e-01 : f32
    %22 = vector.broadcast %cst_8 : f32 to vector<16x128xf32>
    %23 = arith.addf %21, %22 : vector<16x128xf32>
    %24 = arith.subf %1, %19 : vector<16x128xf32>
    %25 = math.absf %24 : vector<16x128xf32>
    %26 = math.sqrt %25 : vector<16x128xf32>
    %27 = arith.mulf %25, %26 : vector<16x128xf32>
    %28 = arith.mulf %11, %23 : vector<16x128xf32>
    %29 = arith.mulf %28, %27 : vector<16x128xf32>
    %30 = vector.shape_cast %29 : vector<16x128xf32> to vector<2x8x128xf32>
    %cst_9 = arith.constant dense<0.000000e+00> : vector<8x128xf32>
    %31 = vector.multi_reduction <add>, %30, %cst_9 [0] : vector<2x8x128xf32> to vector<8x128xf32>
    %c0_i32 = arith.constant 0 : i32
    %32 = arith.cmpi eq, %arg1, %c0_i32 : i32
    %33 = arith.extui %32 : i1 to i32
    %c0_i32_10 = arith.constant 0 : i32
    %34 = arith.cmpi ne, %33, %c0_i32_10 : i32
    scf.if %34 {
      %cst_17 = arith.constant 0.000000e+00 : f32
      %39 = vector.broadcast %cst_17 : f32 to vector<1x8x128xf32>
      %c0_18 = arith.constant 0 : index
      %c0_19 = arith.constant 0 : index
      %c0_20 = arith.constant 0 : index
      %40 = vector.load %arg4[%c0_18, %c0_19, %c0_20] : memref<1x8x128xf32, #tpu.memory_space<vmem>>, vector<1x8x128xf32>
      tpu.vector_store %arg4[%c0_18, %c0_19, %c0_20], %39 {strides = array<i32>} : memref<1x8x128xf32, #tpu.memory_space<vmem>>, vector<1x8x128xf32>,
    } else {
    }
    %c0_11 = arith.constant 0 : index
    %c0_12 = arith.constant 0 : index
    %c0_13 = arith.constant 0 : index
    %35 = vector.load %arg4[%c0_11, %c0_12, %c0_13] : memref<1x8x128xf32, #tpu.memory_space<vmem>>, vector<1x8x128xf32>
    %36 = vector.shape_cast %31 : vector<8x128xf32> to vector<1x8x128xf32>
    %37 = arith.addf %35, %36 : vector<1x8x128xf32>
    %c0_14 = arith.constant 0 : index
    %c0_15 = arith.constant 0 : index
    %c0_16 = arith.constant 0 : index
    %38 = vector.load %arg4[%c0_14, %c0_15, %c0_16] : memref<1x8x128xf32, #tpu.memory_space<vmem>>, vector<1x8x128xf32>
    tpu.vector_store %arg4[%c0_14, %c0_15, %c0_16], %37 {strides = array<i32>} : memref<1x8x128xf32, #tpu.memory_space<vmem>>, vector<1x8x128xf32>,
    return
  }
  func.func @transform_0(%arg0: i32, %arg1: i32) -> (i32, i32) {
    %c1_i32 = arith.constant 1 : i32
    %0 = arith.muli %arg0, %c1_i32 : i32
    %1 = arith.addi %0, %arg1 : i32
    %c0_i32 = arith.constant 0 : i32
    %c0_i32_0 = arith.constant 0 : i32
    return %1, %c0_i32 : i32, i32
  }
  func.func @transform_1(%arg0: i32, %arg1: i32) -> (i32, i32) {
    %c1_i32 = arith.constant 1 : i32
    %0 = arith.muli %arg0, %c1_i32 : i32
    %1 = arith.addi %0, %arg1 : i32
    %c0_i32 = arith.constant 0 : i32
    %c0_i32_0 = arith.constant 0 : i32
    return %1, %c0_i32 : i32, i32
  }
  func.func @transform_2(%arg0: i32, %arg1: i32) -> (i32, i32, i32) {
    %c0_i32 = arith.constant 0 : i32
    %c0_i32_0 = arith.constant 0 : i32
    %c0_i32_1 = arith.constant 0 : i32
    return %arg0, %c0_i32, %c0_i32_0 : i32, i32, i32
  }
}

</mosaic_0001>

<bundles_post_ra>
// kernel: tpu_custom_call.1
= control target key start
LH: loop header
LB: loop body
LE: loop exit
PB: predicated region body
PF: predicated region fallthrough
CT: control target
= control target key end

     0   :  { %7 = vsyncpa [#allocation3], 0  ;;  %s303_s0 = inlined_call_operand.hbm [shape: f32[16,128], index: 0, kind: input, shape index: {}]   ;;  %s304_s1 = inlined_call_operand.hbm [shape: f32[16,128], index: 1, kind: input, shape index: {}]   ;;  %s305_s2 = inlined_call_operand.hbm [shape: f32[1,8,128], index: 2, kind: output, shape index: {}]  }
   0x1   :  { %8 = vsyncpa [#allocation6], 0 }
   0x2   :  { %9 = vsyncpa [#allocation4], 0  ;;  %s247_s9 = smov [#allocation2]   ;;  %s175_s13 = scalar_lea.hbm %s303_s0, 256 }
   0x3   :  { %s19_s10 = sshll.u32 %s247_s9, 4  ;;  %p176_p0 = scmp.ne.s32.totalorder %s303_s0, %s175_s13  ;;  %s20_s10 = int_to_ptr.vmem [resolvable:$true] %s19_s10 }
   0x4   :  { %p179_p1 = scmp.lt.u32.totalorder %s175_s13, %s303_s0 }
   0x6   :  { %p181_p2 = pnand %p179_p1, %p176_p0 }
   0x8   :  { %184 = shalt.err (!%p181_p2)
}
   0x9   :  { %s185_s18 = scalar_lea.vmem %s20_s10, 256  ;;  %p190_p4 = scmp.lt.s32.totalorder %s20_s10, %s20_s10 }
   0xa   :  { %p186_p3 = scmp.ne.s32.totalorder %s20_s10, %s185_s18  ;;  %p191_p5 = scmp.lt.s32.totalorder %s185_s18, %s185_s18 }
   0xc   :  { %p192_p6 = por %p191_p5, %p190_p4 }
   0xe   :  { %p193_p7 = pnand %p192_p6, %p186_p3 }
  0x10   :  { %196 = shalt.err (!%p193_p7)
}
  0x11   :  { %s248_s19 = smov 128   ;;  %s249_s20 = smov 8  }
  0x12   :  { %25 = dma.hbm_to_vmem [thread:$0]  %s303_s0, 256, %s20_s10, [#allocation3], %s248_s19, %s248_s19, %s249_s20  }
  0x13   :  { %s250_s23 = smov [#allocation5]   ;;  %s197_s27 = scalar_lea.hbm %s304_s1, 256 }
  0x14   :  { %s35_s24 = sshll.u32 %s250_s23, 4  ;;  %p198_p8 = scmp.ne.s32.totalorder %s304_s1, %s197_s27  ;;  %s36_s24 = int_to_ptr.vmem [resolvable:$true] %s35_s24 }
  0x15   :  { %p201_p9 = scmp.lt.u32.totalorder %s197_s27, %s304_s1 }
  0x17   :  { %p203_p10 = pnand %p201_p9, %p198_p8 }
  0x19   :  { %206 = shalt.err (!%p203_p10)
}
  0x1a   :  { %s207_s4 = scalar_lea.vmem %s36_s24, 256  ;;  %p212_p12 = scmp.lt.s32.totalorder %s36_s24, %s36_s24 }
  0x1b   :  { %p208_p11 = scmp.ne.s32.totalorder %s36_s24, %s207_s4  ;;  %p213_p13 = scmp.lt.s32.totalorder %s207_s4, %s207_s4 }
  0x1d   :  { %p214_p0 = por %p213_p13, %p212_p12 }
  0x1f   :  { %p215_p1 = pnand %p214_p0, %p208_p11 }
  0x21   :  { %218 = shalt.err (!%p215_p1)
}
  0x22   :  { %41 = dma.hbm_to_vmem [thread:$0]  %s304_s1, 256, %s36_s24, [#allocation6], %s248_s19, %s248_s19, %s249_s20  }
  0x23   :  { %241 = dma.done.wait [#allocation3], 256  }
  0x24   :  { %242 = vsyncadd [#allocation3], 4294967040 }
  0x25   :  { %243 = dma.done.wait [#allocation6], 256  }
  0x26   :  { %244 = vsyncadd [#allocation6], 4294967040  ;;  %v52_v0 = vld [vmem:[#allocation2] sm:$0xff]  ;;  %v53_v1 = vld [vmem:[#allocation2 + $0x8] sm:$0xff]  ;;  %s251_s1 = smov [#allocation7]  }
  0x27   :  { %v56_v2 = vand.u32 2147483647, %v52_v0  ;;  %v57_v3 = vand.u32 2147483647, %v53_v1  ;;  %vm90_vm0 = vcmp.ge.f32.partialorder %v52_v0, 0.0  ;;  %vm91_vm1 = vcmp.ge.f32.partialorder %v53_v1, 0.0 }
  0x28   :  { %v54_v15 = vld [vmem:[#allocation5] sm:$0xff]  ;;  %v55_v17 = vld [vmem:[#allocation5 + $0x8] sm:$0xff]  ;;  %v64_v32 = vmax.f32 %v52_v0, 0.0  ;;  %v65_v34 = vmax.f32 %v53_v1, 0.0  ;;  %s143_s6 = sshll.u32 %s251_s1, 4  ;;  %s144_s6 = int_to_ptr.vmem [resolvable:$true] %s143_s6 }
  0x29   :  { %v58_v4 = vsub.f32 0.0, %v56_v2  ;;  %v59_v5 = vsub.f32 0.0, %v57_v3  ;;  %v66_v33 = vmul.f32 %v54_v15, %v52_v0  ;;  %v67_v35 = vmul.f32 %v55_v17, %v53_v1  ;;  %s219_s7 = scalar_lea.vmem %s144_s6, 128  ;;  %p224_p3 = scmp.lt.s32.totalorder %s144_s6, %s144_s6 }
  0x2a   :  { %v100_v41 = vmul.f32 -0.5, %v54_v15  ;;  %v101_v44 = vmul.f32 -0.5, %v55_v17  ;;  %p220_p2 = scmp.ne.s32.totalorder %s144_s6, %s219_s7  ;;  %p225_p4 = scmp.lt.s32.totalorder %s219_s7, %s219_s7 }
  0x2b   :  { %v60_v6 = vmul.f32 1.442695, %v58_v4  ;;  %v62_v7 = vmul.f32 1.442695, %v59_v5  ;;  %v68_v40 = vsub.f32 %v64_v32, %v66_v33  ;;  %v69_v42 = vsub.f32 %v65_v34, %v67_v35 }
  0x2c   :  { %v102_v47 = vadd.f32 0.75, %v100_v41  ;;  %v103_v50 = vadd.f32 0.75, %v101_v44  ;;  %p226_p5 = por %p225_p4, %p224_p3 }
  0x2d   :  { %159 = vpow2.f32 %v60_v6 }
  0x2e   :  { %161 = vpow2.f32 %v62_v7  ;;  %p227_p6 = pnand %p226_p5, %p220_p2 }
  0x37   :  { %v160_v8 = vpop.eup %159 }
  0x38   :  { %v162_v9 = vpop.eup %161  ;;  %v70_v10 = vadd.f32 1.0, %v160_v8  ;;  %v92_v12 = vsel %vm90_vm0, 1.0, %v160_v8  ;;  %v73_v18 = vmul.f32 -0.5, %v160_v8  ;;  %v76_v27 = vand.u32 2147483647, %v160_v8 }
  0x39   :  { %v79_v11 = vadd.f32 1.0, %v162_v9  ;;  %v93_v13 = vsel %vm91_vm1, 1.0, %v162_v9  ;;  %v82_v20 = vmul.f32 -0.5, %v162_v9  ;;  %v85_v31 = vand.u32 2147483647, %v162_v9 }
  0x3a   :  { %163 = vrcp.f32 %v70_v10  ;;  %v74_v24 = vadd.f32 1.0, %v73_v18  ;;  %vm77_vm2 = vcmp.lt.f32.partialorder %v76_v27, 0.0004427343 }
  0x3b   :  { %165 = vrcp.f32 %v79_v11  ;;  %v83_v28 = vadd.f32 1.0, %v82_v20  ;;  %vm86_vm3 = vcmp.lt.f32.partialorder %v85_v31, 0.0004427343 }
  0x3c   :  { %167 = vlog2.f32 %v70_v10  ;;  %v75_v37 = vmul.f32 %v160_v8, %v74_v24 }
  0x3d   :  { %169 = vlog2.f32 %v79_v11  ;;  %v84_v39 = vmul.f32 %v162_v9, %v83_v28 }
  0x44   :  { %v164_v14 = vpop.eup %163 }
  0x45   :  { %v166_v16 = vpop.eup %165  ;;  %v98_v19 = vmul.f32 %v164_v14, %v92_v12 }
  0x46   :  { %v99_v21 = vmul.f32 %v166_v16, %v93_v13  ;;  %v168_v26 = vpop.eup %167 }
  0x47   :  { %v104_v22 = vsub.f32 %v54_v15, %v98_v19  ;;  %v170_v30 = vpop.eup %169  ;;  %v72_v36 = vmul.f32 0.6931472, %v168_v26 }
  0x48   :  { %v105_v23 = vsub.f32 %v55_v17, %v99_v21  ;;  %v81_v38 = vmul.f32 0.6931472, %v170_v30 }
  0x49   :  { %v106_v25 = vand.u32 2147483647, %v104_v22  ;;  %v78_v43 = vsel %vm77_vm2, %v75_v37, %v72_v36 }
  0x4a   :  { %v107_v29 = vand.u32 2147483647, %v105_v23  ;;  %v87_v45 = vsel %vm86_vm3, %v84_v39, %v81_v38  ;;  %v88_v46 = vadd.f32 %v78_v43, %v68_v40 }
  0x4b   :  { %171 = vrsqrt.f32 %v106_v25  ;;  %v89_v49 = vadd.f32 %v87_v45, %v69_v42  ;;  %vm110_vm4 = vcmp.eq.f32.partialorder %v106_v25, inf  ;;  %v113_v51 = vand.u32 2147483648, %v106_v25 }
  0x4c   :  { %173 = vrsqrt.f32 %v107_v29  ;;  %vm112_vm5 = vcmp.eq.f32.partialorder %v106_v25, 0.0  ;;  %vm117_vm6 = vcmp.eq.f32.partialorder %v107_v29, inf  ;;  %v120_v54 = vand.u32 2147483648, %v107_v29 }
  0x4d   :  { %vm119_vm7 = vcmp.eq.f32.partialorder %v107_v29, 0.0  ;;  %v124_v57 = vmul.f32 %v102_v47, %v88_v46  ;;  %v125_v60 = vmul.f32 %v103_v50, %v89_v49 }
  0x55   :  { %v172_v48 = vpop.eup %171 }
  0x56   :  { %v174_v52 = vpop.eup %173  ;;  %v109_v53 = vmul.f32 %v172_v48, %v106_v25 }
  0x57   :  { %v116_v55 = vmul.f32 %v174_v52, %v107_v29 }
  0x58   :  { %v111_v56 = vsel %vm110_vm4, %v106_v25, %v109_v53 }
  0x59   :  { %v114_v58 = vsel %vm112_vm5, %v113_v51, %v111_v56  ;;  %v118_v59 = vsel %vm117_vm6, %v107_v29, %v116_v55 }
  0x5a   :  { %v121_v61 = vsel %vm119_vm7, %v120_v54, %v118_v59  ;;  %v122_v62 = vmul.f32 %v114_v58, %v106_v25 }
  0x5b   :  { %v123_v63 = vmul.f32 %v121_v61, %v107_v29 }
  0x5c   :  { %v126_v0 = vmul.f32 %v124_v57, %v122_v62 }
  0x5d   :  { %v127_v1 = vmul.f32 %v125_v60, %v123_v63 }
  0x5f   :  { %v128_v2 = vadd.f32 %v127_v1, %v126_v0 }
  0x61   :  { %136 = vst [vmem:[#allocation7] sm:$0xff] %v128_v2 }
  0x62   :  { %230 = shalt.err (!%p227_p6)
}
  0x63   :  { %s231_s10 = scalar_lea.hbm %s305_s2, 128 }
  0x64   :  { %p232_p7 = scmp.ne.s32.totalorder %s305_s2, %s231_s10  ;;  %p235_p8 = scmp.lt.u32.totalorder %s231_s10, %s305_s2 }
  0x66   :  { %p237_p9 = pnand %p235_p8, %p232_p7 }
  0x68   :  { %240 = shalt.err (!%p237_p9)
}
  0x69   :  { %146 = dma.vmem_to_hbm [thread:$0]  %s144_s6, 128, %s305_s2, [#allocation4]  }
  0x6a   :  { %245 = dma.done.wait [#allocation4], 128  }
  0x6b   :  { %246 = vsyncadd [#allocation4], 4294967168 }
  0x6c   :  { %150 = vsyncpa [#allocation3], 1 }
  0x6d   :  { %151 = vsyncpa [#allocation6], 1 }
  0x6e   :  { %152 = vsyncpa [#allocation4], 1 }

</bundles_post_ra>
